<compile_context>
chip_gen: v6e
topology: v6e:2x2x1
jax: 0.10.0
libtpu: 0.0.40
codegen_flags: <defaults>
</compile_context>

<pallas_src>
import functools

import jax
import jax.numpy as jnp
import numpy as np
from jax import lax
from jax.experimental import pallas as pl
from jax.experimental.pallas import tpu as pltpu


def _round_up(x, m):
    return ((x + m - 1) // m) * m


def _style_loss_kernel(feat_ref, target_hbm, loss_ref, g_acc, tgt_vmem, tgt_sem,
                       *, inv_n, K, tk):
    k = pl.program_id(0)
    num_k = pl.num_programs(0)

    @pl.when(k == 0)
    def _():
        g_acc[...] = jnp.zeros_like(g_acc)
        # Kick off the target-Gram DMA once; it overlaps the whole K loop and
        # is consumed only in the epilogue.
        pltpu.make_async_copy(target_hbm, tgt_vmem, tgt_sem).start()

    f = feat_ref[...]                                   # (M, tk), native dtype
    if K % tk != 0:
        # Ragged tail: the last block is partially out-of-bounds (Pallas pads
        # with unspecified data), so zero the invalid columns.  Zero columns
        # contribute nothing to feats @ feats.T.  Cheap VPU select, hidden
        # under the HBM-bound DMA.
        col = lax.broadcasted_iota(jnp.int32, f.shape, 1) + k * tk
        f = jnp.where(col < K, f, jnp.zeros_like(f))

    # Gram partial on the MXU, contracting the K axis of f with itself
    # ("trans_b" form) -- no (tk, M) transpose materialized per step.
    g_acc[...] += lax.dot_general(
        f, f,
        dimension_numbers=(((1,), (1,)), ((), ())),
        preferred_element_type=jnp.float32,
    )

    @pl.when(k == num_k - 1)
    def _():
        pltpu.make_async_copy(target_hbm, tgt_vmem, tgt_sem).wait()
        # inv_n scale folded into one fused epilogue expression.
        diff = g_acc[...] * inv_n - tgt_vmem[...]
        loss_ref[0, 0] = jnp.mean(diff * diff)          # MSE over (M, M)


def gram_matrix_ref(x):
    """Plain-JAX gram matrix (used for target init / verification)."""
    B, C, H, W = x.shape
    feats = x.reshape(B * C, H * W).astype(jnp.float32)
    return (feats @ feats.T) / (B * C * H * W)


_TK_MAX = 16384   # each step should move >> 0.35 us of data even at 3.2 TB/s


def _vmem_limit_bytes():
    """Generation-aware VMEM budget (~75% of physical, capped at 112 MiB)."""
    try:
        cap = pltpu.get_tpu_info().vmem_capacity_bytes
    except Exception:
        cap = 64 * 1024 * 1024            # conservative (v7x-sized) fallback
    return int(min(int(cap * 0.75), 112 * 1024 * 1024))


def _choose_tk(M, K, itemsize, vmem_limit):
    """Largest lane-aligned K tile whose double-buffered blocks fit the budget."""
    k128 = _round_up(K, 128)
    fixed = 2 * M * M * 4                 # f32 Gram accumulator + target scratch
    budget = int(0.8 * vmem_limit) - fixed
    if budget < 2 * M * 128 * itemsize:
        # TODO(synk): tile the (M, M) Gram output for very large B*C instead.
        raise ValueError(
            f"StyleLoss Pallas kernel: B*C={M} residents ({fixed} B) do not fit "
            f"the VMEM budget ({vmem_limit} B); output tiling not implemented.")
    tk = budget // (2 * M * itemsize)     # double-buffered feature block
    tk = max((tk // 128) * 128, 128)
    return int(min(_TK_MAX, tk, k128))


def style_loss_forward(x, target_gram, *, tk=None):
    """Returns (input, loss) matching StyleLoss.forward + self.loss."""
    B, C, H, W = x.shape
    M, K = B * C, H * W
    inv_n = 1.0 / float(B * C * H * W)

    feats = x.reshape(M, K)               # keep native dtype (bf16 stays bf16)
    itemsize = jnp.dtype(feats.dtype).itemsize
    vmem_limit = _vmem_limit_bytes()

    if tk is None:
        tk = _choose_tk(M, K, itemsize, vmem_limit)
    else:
        tk = max(128, (tk // 128) * 128)
        tk = min(tk, _round_up(K, 128))   # never pad past one 128-lane tile

    num_k = pl.cdiv(K, tk)
    target_gram = target_gram.astype(jnp.float32)
    kernel = functools.partial(_style_loss_kernel, inv_n=inv_n, K=K, tk=tk)

    cost = pl.CostEstimate(
        flops=2 * M * M * K,
        bytes_accessed=M * K * itemsize + M * M * 4 + 4,
        transcendentals=0,
    )

    loss = pl.pallas_call(
        kernel,
        out_shape=jax.ShapeDtypeStruct((1, 1), jnp.float32),
        grid_spec=pltpu.PrefetchScalarGridSpec(
            num_scalar_prefetch=0,
            grid=(num_k,),
            in_specs=[
                pl.BlockSpec((M, tk), lambda k: (0, k)),   # feature K-tiles
                pl.BlockSpec(memory_space=pl.ANY),         # target gram, raw HBM
            ],
            out_specs=pl.BlockSpec(memory_space=pltpu.MemorySpace.SMEM),
            scratch_shapes=[
                pltpu.VMEM((M, M), jnp.float32),           # Gram accumulator
                pltpu.VMEM((M, M), jnp.float32),           # target landing buffer
                pltpu.SemaphoreType.DMA(()),               # target DMA semaphore
            ],
        ),
        compiler_params=pltpu.CompilerParams(
            dimension_semantics=("arbitrary",),
            vmem_limit_bytes=vmem_limit,
        ),
        cost_estimate=cost,
    )(feats, target_gram)

    return x, loss[0, 0]


if __name__ == "__main__":
    key = jax.random.PRNGKey(0)
    k1, k2, k3, k4 = jax.random.split(key, 4)

    # --- main check: B=2, C=4, H=W=16 (K multiple of 128) ---
    B, C, H, W = 2, 4, 16, 16
    target_feature = jax.random.normal(k1, (B, C, H, W), dtype=jnp.float32)
    x = jax.random.normal(k2, (B, C, H, W), dtype=jnp.float32)

    # "__init__": target gram computed once from the target feature map.
    target_gram = gram_matrix_ref(target_feature)

    out, loss = style_loss_forward(x, target_gram)
    out = jax.block_until_ready(out)
    loss = jax.block_until_ready(loss)

    G_ref = gram_matrix_ref(x)
    loss_ref = jnp.mean((G_ref - target_gram) ** 2)
    assert np.allclose(np.asarray(loss), np.asarray(loss_ref), rtol=1e-5, atol=1e-6)
    assert np.array_equal(np.asarray(out), np.asarray(x))  # forward returns input

    # --- second check: spatial size not a multiple of 128 (masked ragged tail) ---
    B2, C2, H2, W2 = 1, 6, 14, 14
    tf2 = jax.random.normal(k3, (B2, C2, H2, W2), dtype=jnp.float32)
    x2 = jax.random.normal(k4, (B2, C2, H2, W2), dtype=jnp.float32)
    tg2 = gram_matrix_ref(tf2)
    out2, loss2 = style_loss_forward(x2, tg2)
    loss2 = jax.block_until_ready(loss2)
    loss2_ref = jnp.mean((gram_matrix_ref(x2) - tg2) ** 2)
    assert np.allclose(np.asarray(loss2), np.asarray(loss2_ref), rtol=1e-5, atol=1e-6)
    assert np.array_equal(np.asarray(out2), np.asarray(x2))

    # --- third check: explicit small tk -> multi-step K loop with masked last tile ---
    out3, loss3 = style_loss_forward(x2, tg2, tk=128)
    loss3 = jax.block_until_ready(loss3)
    assert np.allclose(np.asarray(loss3), np.asarray(loss2_ref), rtol=1e-5, atol=1e-6)

    print("KERNEL_OK")
</pallas_src>

<mosaic_0001>
module attributes {stable_mosaic.version = 11 : i64} {
  func.func @_style_loss_kernel(%arg0: i32, %arg1: memref<8x256xf32, #tpu.memory_space<vmem>>, %arg2: memref<8x8xf32, #tpu.memory_space<any>>, %arg3: memref<1x1xf32, #tpu.memory_space<smem>>, %arg4: memref<8x8xf32, #tpu.memory_space<vmem>>, %arg5: memref<8x8xf32, #tpu.memory_space<vmem>>, %arg6: memref<!tpu.dma_semaphore, #tpu.memory_space<semaphore_mem>>) attributes {dimension_semantics = [#tpu.dimension_semantics<arbitrary>], iteration_bounds = array<i64: 1>, scalar_prefetch = 0 : i64, scratch_operands = 3 : i64, tpu.core_type = #tpu.core_type<tc>, window_params = [{transform_indices = @transform_0, window_bounds = array<i64: 8, 256>}, {}, {transform_indices = @transform_2, window_bounds = array<i64: 1, 1>}]} {
    %c0_i32 = arith.constant 0 : i32
    %0 = arith.cmpi eq, %arg0, %c0_i32 : i32
    %1 = arith.extui %0 : i1 to i32
    %c0_i32_0 = arith.constant 0 : i32
    %2 = arith.cmpi ne, %1, %c0_i32_0 : i32
    scf.if %2 {
      %cst_8 = arith.constant 0.000000e+00 : f32
      %11 = vector.broadcast %cst_8 : f32 to vector<8x8xf32>
      %c0_9 = arith.constant 0 : index
      %c0_10 = arith.constant 0 : index
      %12 = vector.load %arg4[%c0_9, %c0_10] : memref<8x8xf32, #tpu.memory_space<vmem>>, vector<8x8xf32>
      tpu.vector_store %arg4[%c0_9, %c0_10], %11 {strides = array<i32>} : memref<8x8xf32, #tpu.memory_space<vmem>>, vector<8x8xf32>,
      tpu.enqueue_dma source(%arg2 : memref<8x8xf32, #tpu.memory_space<any>>) target(%arg5 : memref<8x8xf32, #tpu.memory_space<vmem>>) target_semaphore(%arg6 : memref<!tpu.dma_semaphore, #tpu.memory_space<semaphore_mem>>)
    } else {
    }
    %c0 = arith.constant 0 : index
    %c0_1 = arith.constant 0 : index
    %3 = vector.load %arg1[%c0, %c0_1] : memref<8x256xf32, #tpu.memory_space<vmem>>, vector<8x256xf32>
    %c0_2 = arith.constant 0 : index
    %c0_3 = arith.constant 0 : index
    %4 = vector.load %arg4[%c0_2, %c0_3] : memref<8x8xf32, #tpu.memory_space<vmem>>, vector<8x8xf32>
    %cst = arith.constant dense<0.000000e+00> : vector<8x8xf32>
    %5 = tpu.matmul %3, %3, %cst {dimension_numbers = #tpu.dot_dimension_numbers<[1], [1], [0], [0], [0, 0, 1, 0], [], []>} : vector<8x256xf32>, vector<8x256xf32>, vector<8x8xf32> -> vector<8x8xf32>
    %6 = arith.addf %4, %5 : vector<8x8xf32>
    %c0_4 = arith.constant 0 : index
    %c0_5 = arith.constant 0 : index
    %7 = vector.load %arg4[%c0_4, %c0_5] : memref<8x8xf32, #tpu.memory_space<vmem>>, vector<8x8xf32>
    tpu.vector_store %arg4[%c0_4, %c0_5], %6 {strides = array<i32>} : memref<8x8xf32, #tpu.memory_space<vmem>>, vector<8x8xf32>,
    %c0_i32_6 = arith.constant 0 : i32
    %8 = arith.cmpi eq, %arg0, %c0_i32_6 : i32
    %9 = arith.extui %8 : i1 to i32
    %c0_i32_7 = arith.constant 0 : i32
    %10 = arith.cmpi ne, %9, %c0_i32_7 : i32
    scf.if %10 {
      tpu.wait_dma2 semaphore(%arg6 : memref<!tpu.dma_semaphore, #tpu.memory_space<semaphore_mem>>) src(%arg2 : memref<8x8xf32, #tpu.memory_space<any>>) dst(%arg5 : memref<8x8xf32, #tpu.memory_space<vmem>>)
      %c0_8 = arith.constant 0 : index
      %c0_9 = arith.constant 0 : index
      %11 = vector.load %arg4[%c0_8, %c0_9] : memref<8x8xf32, #tpu.memory_space<vmem>>, vector<8x8xf32>
      %cst_10 = arith.constant 4.8828125E-4 : f32
      %12 = vector.broadcast %cst_10 : f32 to vector<8x8xf32>
      %13 = arith.mulf %11, %12 : vector<8x8xf32>
      %c0_11 = arith.constant 0 : index
      %c0_12 = arith.constant 0 : index
      %14 = vector.load %arg5[%c0_11, %c0_12] : memref<8x8xf32, #tpu.memory_space<vmem>>, vector<8x8xf32>
      %15 = arith.subf %13, %14 : vector<8x8xf32>
      %16 = arith.mulf %15, %15 : vector<8x8xf32>
      %17 = vector.shape_cast %16 : vector<8x8xf32> to vector<1x8x8xf32>
      %cst_13 = arith.constant dense<0.000000e+00> : vector<1xf32>
      %18 = vector.multi_reduction <add>, %17, %cst_13 [1, 2] : vector<1x8x8xf32> to vector<1xf32>
      %19 = vector.shape_cast %18 : vector<1xf32> to vector<1x1x1xf32>
      %20 = vector.extract %19[0, 0, 0] : f32 from vector<1x1x1xf32>
      %cst_14 = arith.constant 6.400000e+01 : f32
      %21 = arith.divf %20, %cst_14 : f32
      %c0_15 = arith.constant 0 : index
      %c0_16 = arith.constant 0 : index
      %22 = memref.load %arg3[%c0_15, %c0_16] : memref<1x1xf32, #tpu.memory_space<smem>>
      memref.store %21, %arg3[%c0_15, %c0_16] : memref<1x1xf32, #tpu.memory_space<smem>>
    } else {
    }
    return
  }
  func.func @transform_0(%arg0: i32) -> (i32, i32) {
    %c0_i32 = arith.constant 0 : i32
    %c0_i32_0 = arith.constant 0 : i32
    return %c0_i32, %arg0 : i32, i32
  }
  func.func @transform_2(%arg0: i32) -> (i32, i32) {
    %c0_i32 = arith.constant 0 : i32
    %c0_i32_0 = arith.constant 0 : i32
    %c0_i32_1 = arith.constant 0 : i32
    return %c0_i32, %c0_i32_0 : i32, i32
  }
}

</mosaic_0001>

<bundles_post_ra>
// kernel: tpu_custom_call.1
= control target key start
LH: loop header
LB: loop body
LE: loop exit
PB: predicated region body
PF: predicated region fallthrough
CT: control target
= control target key end

     0   :  { %7 = vsyncpa [#allocation6], 0  ;;  %s253_s0 = inlined_call_operand.hbm [shape: f32[8,256], index: 0, kind: input, shape index: {}]   ;;  %s254_s1 = inlined_call_operand.hbm [shape: f32[8,8], index: 1, kind: input, shape index: {}]   ;;  %s255_s2 = inlined_call_operand.hbm [shape: f32[1,1], index: 2, kind: output, shape index: {}]  }
   0x1   :  { %8 = vsyncpa [#allocation7], 0  ;;  %s222_s9 = smov [#allocation5]  }
   0x2   :  { %s15_s10 = sshll.u32 %s222_s9, 4  ;;  %s16_s10 = int_to_ptr.vmem [resolvable:$true] %s15_s10 }
   0x3   :  { %s176_s11 = scalar_lea.vmem %s16_s10, 256  ;;  %p181_p1 = scmp.lt.s32.totalorder %s16_s10, %s16_s10 }
   0x4   :  { %p177_p0 = scmp.ne.s32.totalorder %s16_s10, %s176_s11  ;;  %p182_p2 = scmp.lt.s32.totalorder %s176_s11, %s176_s11 }
   0x6   :  { %p183_p3 = por %p182_p2, %p181_p1 }
   0x8   :  { %p184_p4 = pnand %p183_p3, %p177_p0 }
   0xa   :  { %187 = shalt.err (!%p184_p4)
}
   0xb   :  { %18 = dma.hbm_to_vmem [thread:$0]  %s253_s0, 256, %s16_s10, [#allocation6]  }
   0xc   :  { %216 = dma.done.wait [#allocation6], 256  }
   0xd   :  { %217 = vsyncadd [#allocation6], 4294967040  ;;  %vm26_vm0 = vcmask 64512   ;;  %v223_v0 = vmov 0.0   ;;  %v40_v1 = vld [vmem:[#allocation5 + $0x8] sm:$0xff]  ;;  %v39_v2 = vld [vmem:[#allocation5] sm:$0xff] }
   0xe   :  { %27 = vst.msk [vmem:[#allocation2] sm:$0xff] %vm26_vm0, %v223_v0  ;;  %72 = vmatprep.subr.mxu0 %v40_v1  ;;  %106 = vmatprep.mubr.f32.mxu0 %v40_v1  ;;  %s224_s14 = smov [#allocation3]  }
   0xf   :  { %73 = vmatpush1.xpose.msra.mxu0 %v39_v2  ;;  %s35_s15 = sshll.u32 %s224_s14, 4  ;;  %s36_s15 = int_to_ptr.vmem [resolvable:$true] %s35_s15 }
  0x10   :  { %s196_s16 = scalar_lea.vmem %s36_s15, 128  ;;  %p201_p6 = scmp.lt.s32.totalorder %s36_s15, %s36_s15 }
  0x11   :  { %p197_p5 = scmp.ne.s32.totalorder %s36_s15, %s196_s16  ;;  %p202_p7 = scmp.lt.s32.totalorder %s196_s16, %s196_s16 }
  0x12   :  { %107 = vmatmul.mubr.f32.vlgmr.msra.gmra.mxu0 %v39_v2 }
  0x13   :  { %p203_p8 = por %p202_p7, %p201_p6 }
  0x15   :  { %p204_p9 = pnand %p203_p8, %p197_p5 }
  0x17   :  { %207 = shalt.err (!%p204_p9)  }
  0x18   :  { %38 = dma.hbm_to_vmem [thread:$0]  %s254_s1, 128, %s36_s15, [#allocation4]  ;;  %v41_v3 = vld [vmem:[#allocation2] sm:$0xff] }
  0xd2   :  { %v108_v4 = vpop.f32.mrf.mxu0 }
  0xd3   :  { %v112_v5 = vadd.f32 %v108_v4, %v41_v3 }
  0xd4   :  { %v110_v6 = vpop.f32.mrf.mxu0 }
  0xd5   :  { %114 = vst.msk [vmem:[#allocation2] sm:$0xff] %vm26_vm0, %v112_v5 }
  0xd6   :  { %218 = dma.done.wait [#allocation4], 128 }
  0xd7   :  { %219 = vsyncadd [#allocation4], 4294967168  ;;  %v123_v8 = vld [vmem:[#allocation3] sm:$0xff]  ;;  %s225_s19 = smov [#allocation8]  }
  0xdc   :  { %v121_v7 = vld [vmem:[#allocation2] sm:$0xff] }
  0xdd   :  { %v122_v9 = vmul.f32 0.00048828125, %v121_v7 }
  0xdf   :  { %v124_v10 = vsub.f32 %v122_v9, %v123_v8 }
  0xe1   :  { %v125_v11 = vmul.f32 %v124_v10, %v124_v10 }
  0xe3   :  { %v126_v12 = vsel %vm26_vm0, %v125_v11, 0.0 }
  0xe4   :  { %127 = vadd.xlane.f32.xlu0 %v126_v12 }
 0x16d   :  { %v128_v13 = vpop.xlane.xlu0 %127 }
 0x16e   :  { %v129_v14 = vrot.slane %v128_v13, 4 }
 0x170   :  { %v130_v15 = vadd.f32 %v129_v14, %v128_v13 }
 0x172   :  { %v131_v16 = vrot.slane %v130_v15, 2 }
 0x174   :  { %v132_v17 = vadd.f32 %v131_v16, %v130_v15 }
 0x176   :  { %v133_v18 = vrot.slane %v132_v17, 1 }
 0x178   :  { %v134_v19 = vadd.f32 %v133_v18, %v132_v17 }
 0x17a   :  { %162 = vpush %v134_v19 }
 0x1ab   :  { %s163_s1 = spop %162 }
 0x1ac   :  { %s138_s18 = smul.f32 0.015625, %s163_s1 }
 0x1ae   :  { %140 = sst [smem:[#allocation8]] %s138_s18 }
 0x1af   :  { %148 = dma.smem_to_hbm %s225_s19, 16, %s255_s2, [#allocation7]  }
 0x1b0   :  { %220 = dma.done.wait [#allocation7], 16  }
 0x1b1   :  { %221 = vsyncadd [#allocation7], 4294967280 }
 0x1b2   :  { %152 = sfence }
 0x1b3   :  { %153 = vsyncpa [#allocation6], 1 }
 0x1b4   :  { %154 = vsyncpa [#allocation7], 1 }
 0x1b5   :  { %155 = vsyncmov [#allocation4] }
 0x1b8   :  { %s156_s22 = vpop.sfrf %155 }
 0x1b9   :  { %p161_p10 = scmp.ne.s32.totalorder %s156_s22, 0 }
 0x1bb   :  { %160 = shalt.err (%p161_p10)  }

</bundles_post_ra>
